<compile_context>
chip_gen: v7x
topology: tpu7x:2x2x1
jax: 0.10.0
libtpu: 0.0.40
codegen_flags: <defaults>
</compile_context>

<pallas_src>
from math import sqrt
import functools

import jax
import jax.numpy as jnp
from jax.experimental import pallas as pl
from jax.experimental.pallas import tpu as pltpu


_MASK_VALUE = -1e30  # finite "-inf": exp(masked - m) underflows to 0, never NaNs


# --------------------------------------------------------------------------
# Hardware / budgeting helpers
# --------------------------------------------------------------------------
@functools.lru_cache(maxsize=None)
def _physical_vmem_bytes():
    """Per-core VMEM capacity; conservative 64 MiB fallback (v7x floor)."""
    try:
        info = pltpu.get_tpu_info()
    except Exception:
        return 64 << 20
    for name in ("vmem_capacity_bytes", "vmem_bytes", "vmem_size_bytes"):
        v = getattr(info, name, None)
        if v:
            try:
                return int(v)
            except (TypeError, ValueError):
                pass
    return 64 << 20


def _vmem_limit(working_set_bytes):
    """Scoped-VMEM request: 2x working set + slack, clamped to physical - 8 MiB."""
    phys = _physical_vmem_bytes()
    hi = max(16 << 20, phys - (8 << 20))
    lo = 16 << 20
    return int(min(max(2 * working_set_bytes + (2 << 20), lo), hi))


def _pick_block(n, cap):
    """Largest divisor of n that is <= cap (and >= 8), else the full dim.

    Searches all divisors (not just powers of two) so oddly-factored dims still
    get bounded tiles.  Prime-ish dims fall back to the full dimension
    (TODO(synk): masked partial last block)."""
    cap = max(8, min(cap, n))
    for c in range(cap, 7, -1):
        if n % c == 0:
            return c
    return n


def _pick_head_groups(model_dim, num_heads, itemsize, budget=16 << 20):
    """Number of head groups for the projection's Dout tiling.

    The weight block is (D, D // groups); groups > 1 requires the block's last
    dim to be a multiple of 128.  Pick the smallest group count whose
    double-buffered weight block fits `budget`."""
    best = 1
    for g in range(1, num_heads + 1):
        if num_heads % g:
            continue
        thd = model_dim // g
        if g > 1 and thd % 128 != 0:
            continue
        best = g
        if 2 * model_dim * thd * itemsize <= budget:
            break
    return best


def _attn_tiles(lq, lk, hd, model_dim, mm_itm, out_itm):
    """Pick (TQ, TKV) so the attention step's working set fits a VMEM budget."""
    phys = _physical_vmem_bytes()
    budget = max(8 << 20, min(phys // 3, 32 << 20))
    tq_cap, tkv_cap = 256, 512

    def est(tq, tkv):
        return (2 * tq * hd * mm_itm            # q block (double-buffered)
                + 4 * tkv * hd * mm_itm         # k + v blocks
                + 2 * hd * model_dim * mm_itm   # wo block
                + 2 * model_dim * 4             # bo
                + 2 * tq * model_dim * out_itm  # output block
                + tq * model_dim * 4            # out accumulator scratch
                + tq * hd * 4 + 2 * tq * 4      # acc, m, l scratch
                + 3 * tq * tkv * 4)             # s / p / mask temporaries

    while True:
        tq = _pick_block(lq, tq_cap)
        tkv = _pick_block(lk, tkv_cap)
        if est(tq, tkv) <= budget or (tq_cap <= 8 and tkv_cap <= 8):
            return tq, tkv
        if tkv_cap >= tq_cap and tkv_cap > 8:
            tkv_cap //= 2
        else:
            tq_cap //= 2


# --------------------------------------------------------------------------
# Fused Q/K/V projection kernel (writes head-major outputs directly):
#   y_i = (x_i @ W_i + b_i) * scale_i ; out_i[h] = y_i[:, h*hd:(h+1)*hd]
# --------------------------------------------------------------------------
def _proj_heads_kernel(*refs, n, heads_per_group, hd, scales):
    xs = refs[0:n]
    ws = refs[n:2 * n]
    bs = refs[2 * n:3 * n]
    os_ = refs[3 * n:4 * n]
    for i in range(n):
        x = xs[i][...]                                        # (TL, D)
        y = jnp.dot(x, ws[i][...], preferred_element_type=jnp.float32)
        y = y + bs[i][...]                                    # bias in f32
        if scales[i] != 1.0:     # static: folds 1/sqrt(head_dim) into Q
            y = y * scales[i]
        y = y.astype(os_[i].dtype)
        # Head split via lane slices inside the kernel: no HBM round-trip
        # transpose, the output lands directly in head-major layout.
        for hh in range(heads_per_group):
            os_[i][hh] = y[:, hh * hd:(hh + 1) * hd]


def _project_heads(xs, ws, bs, scales, *, num_heads, mm_dtype):
    """Project a list of (R, D) activations; return head-major (H, R, hd) arrays."""
    n = len(xs)
    R, D = xs[0].shape
    hd = D // num_heads
    itm = jnp.dtype(mm_dtype).itemsize

    phys = _physical_vmem_bytes()
    tl_cap = 1024 if phys >= (96 << 20) else 512      # bigger row tiles on 128 MiB parts
    while tl_cap > 8 and 2 * n * tl_cap * D * itm > (16 << 20):
        tl_cap //= 2
    tl = _pick_block(R, tl_cap)

    n_g = _pick_head_groups(D, num_heads, itm)        # Dout tiling for huge D (v7x)
    hpg = num_heads // n_g
    thd = D // n_g
    grid = (R // tl, n_g)

    working = n * (2 * tl * D * itm            # x blocks
                   + 2 * D * thd * itm         # weight blocks
                   + 2 * thd * 4               # bias blocks
                   + 2 * hpg * tl * hd * itm   # output blocks
                   + tl * thd * 4)             # f32 accumulator values

    x_spec = pl.BlockSpec((tl, D), lambda r, g: (r, 0))
    w_spec = pl.BlockSpec((D, thd), lambda r, g: (0, g))
    b_spec = pl.BlockSpec((1, thd), lambda r, g: (0, g))
    o_spec = pl.BlockSpec((hpg, tl, hd), lambda r, g: (g, r, 0))

    out_shape = tuple(jax.ShapeDtypeStruct((num_heads, R, hd), mm_dtype)
                      for _ in range(n))

    outs = pl.pallas_call(
        functools.partial(_proj_heads_kernel, n=n, heads_per_group=hpg,
                          hd=hd, scales=tuple(float(s) for s in scales)),
        out_shape=out_shape,
        grid_spec=pltpu.PrefetchScalarGridSpec(
            num_scalar_prefetch=0,
            grid=grid,
            in_specs=[x_spec] * n + [w_spec] * n + [b_spec] * n,
            out_specs=tuple([o_spec] * n),
        ),
        compiler_params=pltpu.CompilerParams(
            dimension_semantics=("parallel", "parallel"),
            vmem_limit_bytes=_vmem_limit(working)),
    )(*xs, *ws, *bs)

    if not isinstance(outs, (list, tuple)):
        outs = (outs,)
    return tuple(outs)


# --------------------------------------------------------------------------
# Flash attention kernel with fused output projection.
# Grid: (batch, q-blocks, heads, kv-blocks); heads & kv are "arbitrary".
# Q/K/V are head-major (H, B, L, hd); output is lane-dense (B, Lq, D).
# --------------------------------------------------------------------------
def _flash_mha_kernel(q_ref, k_ref, v_ref, wo_ref, bo_ref, o_ref,
                      m_ref, l_ref, acc_ref, oacc_ref, *, causal, tq, tkv):
    h = pl.program_id(2)
    kv = pl.program_id(3)
    n_h = pl.num_programs(2)
    n_kv = pl.num_programs(3)

    @pl.when(jnp.logical_and(h == 0, kv == 0))
    def _():  # new (batch, q-block): reset the fused-projection accumulator
        oacc_ref[...] = jnp.zeros_like(oacc_ref)

    @pl.when(kv == 0)
    def _():  # new head: reset online-softmax state
        m_ref[...] = jnp.full(m_ref.shape, _MASK_VALUE, m_ref.dtype)
        l_ref[...] = jnp.zeros_like(l_ref)
        acc_ref[...] = jnp.zeros_like(acc_ref)

    q = q_ref[0, 0]                       # (TQ, hd)   scale already folded in
    k = k_ref[0, 0]                       # (TKV, hd)
    v = v_ref[0, 0]                       # (TKV, hd)

    # QK^T with K contracted on its last dim (no explicit transpose), f32 acc.
    s = jax.lax.dot_general(q, k, (((1,), (1,)), ((), ())),
                            preferred_element_type=jnp.float32)   # (TQ, TKV)

    keep = None
    if causal:
        q0 = pl.program_id(1) * tq
        k0 = kv * tkv
        row = jax.lax.broadcasted_iota(jnp.int32, (tq, tkv), 0) + q0
        col = jax.lax.broadcasted_iota(jnp.int32, (tq, tkv), 1) + k0
        keep = col <= row
        s = jnp.where(keep, s, _MASK_VALUE)

    # Online softmax (f32).
    m_prev = m_ref[...]                                           # (TQ, 1)
    m_new = jnp.maximum(m_prev, jnp.max(s, axis=-1, keepdims=True))
    alpha = jnp.exp(m_prev - m_new)
    p = jnp.exp(s - m_new)
    if causal:
        p = jnp.where(keep, p, 0.0)       # bulletproof vs fully-masked tiles
    l_ref[...] = alpha * l_ref[...] + jnp.sum(p, axis=-1, keepdims=True)
    acc_ref[...] = alpha * acc_ref[...] + jnp.dot(
        p.astype(v.dtype), v, preferred_element_type=jnp.float32)
    m_ref[...] = m_new

    @pl.when(kv == n_kv - 1)
    def _():  # head done: fold this head's output through its wo row block
        o_h = acc_ref[...] * pl.reciprocal(l_ref[...], approx=True)   # (TQ, hd)
        oacc_ref[...] += jnp.dot(o_h.astype(wo_ref.dtype), wo_ref[0],
                                 preferred_element_type=jnp.float32)

    @pl.when(jnp.logical_and(h == n_h - 1, kv == n_kv - 1))
    def _():  # all heads done: add bias, single lane-dense (TQ, D) store
        o_ref[0] = (oacc_ref[...] + bo_ref[...]).astype(o_ref.dtype)


def _flash_mha(qh, kh, vh, wo3, bo2, *, causal, out_dtype,
               q_block=None, kv_block=None):
    H, B, Lq, hd = qh.shape
    Lk = kh.shape[2]
    D = H * hd
    mm_itm = jnp.dtype(qh.dtype).itemsize
    out_itm = jnp.dtype(out_dtype).itemsize

    tq = q_block if (q_block and Lq % q_block == 0) else None
    tkv = kv_block if (kv_block and Lk % kv_block == 0) else None
    if tq is None or tkv is None:
        auto_tq, auto_tkv = _attn_tiles(Lq, Lk, hd, D, mm_itm, out_itm)
        tq = tq or auto_tq
        tkv = tkv or auto_tkv

    grid = (B, Lq // tq, H, Lk // tkv)

    working = (2 * tq * hd * mm_itm + 4 * tkv * hd * mm_itm
               + 2 * hd * D * mm_itm + 2 * D * 4
               + 2 * tq * D * out_itm + tq * D * 4
               + tq * hd * 4 + 2 * tq * 4 + 3 * tq * tkv * 4)

    return pl.pallas_call(
        functools.partial(_flash_mha_kernel, causal=causal, tq=tq, tkv=tkv),
        out_shape=jax.ShapeDtypeStruct((B, Lq, D), out_dtype),
        grid_spec=pltpu.PrefetchScalarGridSpec(
            num_scalar_prefetch=0,
            grid=grid,
            in_specs=[
                pl.BlockSpec((1, 1, tq, hd), lambda b, qb, h, kv: (h, b, qb, 0)),
                pl.BlockSpec((1, 1, tkv, hd), lambda b, qb, h, kv: (h, b, kv, 0)),
                pl.BlockSpec((1, 1, tkv, hd), lambda b, qb, h, kv: (h, b, kv, 0)),
                pl.BlockSpec((1, hd, D), lambda b, qb, h, kv: (h, 0, 0)),
                pl.BlockSpec((1, D), lambda b, qb, h, kv: (0, 0)),
            ],
            out_specs=pl.BlockSpec((1, tq, D), lambda b, qb, h, kv: (b, qb, 0)),
            scratch_shapes=[
                pltpu.VMEM((tq, 1), jnp.float32),    # running max m
                pltpu.VMEM((tq, 1), jnp.float32),    # running sum l
                pltpu.VMEM((tq, hd), jnp.float32),   # per-head accumulator
                pltpu.VMEM((tq, D), jnp.float32),    # fused-wo output accumulator
            ],
        ),
        compiler_params=pltpu.CompilerParams(
            dimension_semantics=("parallel", "parallel", "arbitrary", "arbitrary"),
            vmem_limit_bytes=_vmem_limit(working)),
    )(qh, kh, vh, wo3, bo2)


# --------------------------------------------------------------------------
# Public wrapper mirroring attention_Layer.forward
# --------------------------------------------------------------------------
def attention_layer_pallas(query, key, value, params, *, num_heads, mask=False,
                           matmul_dtype=None, q_block=None, kv_block=None):
    """Pallas equivalent of attention_Layer.forward.

    query: (B, Lq, D); key, value: (B, Lk, D).  Returns (B, Lq, D) in query.dtype.
    params: dict with wq, wk, wv, wo of shape (D, D) and bq, bk, bv, bo of shape (D,).
    matmul_dtype: optional dtype for MXU operands (e.g. jnp.bfloat16 — recommended
        default on bandwidth-starved v5e); accumulation/softmax always run in f32.
    q_block / kv_block: optional tile-size overrides (must divide Lq / Lk).
    """
    B, Lq, D = query.shape
    Lk = key.shape[1]
    assert D % num_heads == 0
    hd = D // num_heads
    out_dtype = query.dtype
    mm = jnp.dtype(out_dtype) if matmul_dtype is None else jnp.dtype(matmul_dtype)
    scale = 1.0 / sqrt(hd)

    wq = params["wq"].astype(mm)
    wk = params["wk"].astype(mm)
    wv = params["wv"].astype(mm)
    wo3 = params["wo"].reshape(num_heads, hd, D).astype(mm)     # per-head row blocks
    bq = params["bq"].reshape(1, D).astype(jnp.float32)
    bk = params["bk"].reshape(1, D).astype(jnp.float32)
    bv = params["bv"].reshape(1, D).astype(jnp.float32)
    bo2 = params["bo"].reshape(1, D).astype(jnp.float32)

    q2 = query.reshape(B * Lq, D).astype(mm)
    k2 = key.reshape(B * Lk, D).astype(mm)
    v2 = value.reshape(B * Lk, D).astype(mm)

    # Fused Q/K/V projection (single pallas_call) writing head-major outputs.
    if Lq == Lk:
        Qf, Kf, Vf = _project_heads([q2, k2, v2], [wq, wk, wv], [bq, bk, bv],
                                    [scale, 1.0, 1.0],
                                    num_heads=num_heads, mm_dtype=mm)
    else:
        (Qf,) = _project_heads([q2], [wq], [bq], [scale],
                               num_heads=num_heads, mm_dtype=mm)
        Kf, Vf = _project_heads([k2, v2], [wk, wv], [bk, bv], [1.0, 1.0],
                                num_heads=num_heads, mm_dtype=mm)

    # Free reshapes only (no transposes): (H, B*L, hd) -> (H, B, L, hd).
    Qh = Qf.reshape(num_heads, B, Lq, hd)
    Kh = Kf.reshape(num_heads, B, Lk, hd)
    Vh = Vf.reshape(num_heads, B, Lk, hd)

    return _flash_mha(Qh, Kh, Vh, wo3, bo2, causal=mask, out_dtype=out_dtype,
                      q_block=q_block, kv_block=kv_block)


# --------------------------------------------------------------------------
# Pure-JAX reference mirroring the PyTorch forward exactly.
# --------------------------------------------------------------------------
def attention_layer_ref(query, key, value, params, *, num_heads, mask=False):
    B, Lq, D = query.shape
    Lk = key.shape[1]
    head_dim = D // num_heads

    def lin(x, w, b):
        return x @ w + b

    Q = lin(query, params["wq"], params["bq"])
    K = lin(key, params["wk"], params["bk"])
    V = lin(value, params["wv"], params["bv"])

    # torch.cat(torch.split(x, head_dim, dim=-1), dim=0)
    def split_heads(x):
        chunks = [x[..., h * head_dim:(h + 1) * head_dim] for h in range(num_heads)]
        return jnp.concatenate(chunks, axis=0)               # (H*B, L, hd)

    Qh, Kh, Vh = split_heads(Q), split_heads(K), split_heads(V)
    scores = Qh @ jnp.swapaxes(Kh, -1, -2) / sqrt(head_dim)
    if mask:
        row = jnp.arange(Lq)[:, None]
        col = jnp.arange(Lk)[None, :]
        scores = jnp.where(col <= row, scores, -jnp.inf)
    attn = jax.nn.softmax(scores, axis=-1)
    out = attn @ Vh                                           # (H*B, Lq, hd)
    out = jnp.concatenate([out[h * B:(h + 1) * B] for h in range(num_heads)], axis=-1)
    return lin(out, params["wo"], params["bo"])


def init_params(key, model_dim):
    """Deterministic nn.Linear-style init: U(-1/sqrt(in), 1/sqrt(in))."""
    bound = 1.0 / sqrt(model_dim)
    names = ["wq", "wk", "wv", "wo", "bq", "bk", "bv", "bo"]
    keys = jax.random.split(key, len(names))
    params = {}
    for i, n in enumerate(names):
        shape = (model_dim, model_dim) if n.startswith("w") else (model_dim,)
        params[n] = jax.random.uniform(keys[i], shape, jnp.float32, -bound, bound)
    return params


if __name__ == "__main__":
    model_dim = 32
    num_heads = 8
    batch = 2
    seq = 8

    root = jax.random.PRNGKey(0)
    k_p, k_q, k_k, k_v, k_q2, k_k2, k_v2 = jax.random.split(root, 7)
    params = init_params(k_p, model_dim)

    query = jax.random.normal(k_q, (batch, seq, model_dim), jnp.float32)
    key = jax.random.normal(k_k, (batch, seq, model_dim), jnp.float32)
    value = jax.random.normal(k_v, (batch, seq, model_dim), jnp.float32)

    # 1) f32 path, no mask.
    out = jax.block_until_ready(
        attention_layer_pallas(query, key, value, params,
                               num_heads=num_heads, mask=False))
    ref = attention_layer_ref(query, key, value, params,
                              num_heads=num_heads, mask=False)
    assert out.shape == (batch, seq, model_dim)
    assert jnp.allclose(out, ref, atol=2e-2, rtol=2e-2), \
        "f32 kernel mismatch vs reference"

    # 2) f32 path with causal mask.
    out_m = jax.block_until_ready(
        attention_layer_pallas(query, key, value, params,
                               num_heads=num_heads, mask=True))
    ref_m = attention_layer_ref(query, key, value, params,
                                num_heads=num_heads, mask=True)
    assert jnp.allclose(out_m, ref_m, atol=2e-2, rtol=2e-2), \
        "masked kernel mismatch vs reference"

    # 3) bf16-matmul path (f32 accumulation/softmax) — looser tolerance.
    out_bf16 = jax.block_until_ready(
        attention_layer_pallas(query, key, value, params, num_heads=num_heads,
                               mask=False, matmul_dtype=jnp.bfloat16))
    assert jnp.allclose(out_bf16.astype(jnp.float32), ref, atol=0.25, rtol=0.25), \
        "bf16 kernel mismatch vs reference"

    # 4) Cross-attention (Lq != Lk), causal, small forced tiles so the flash
    #    (online-softmax) loop runs over multiple q and kv blocks.
    q4 = jax.random.normal(k_q2, (batch, 16, model_dim), jnp.float32)
    k4 = jax.random.normal(k_k2, (batch, 24, model_dim), jnp.float32)
    v4 = jax.random.normal(k_v2, (batch, 24, model_dim), jnp.float32)
    out4 = jax.block_until_ready(
        attention_layer_pallas(q4, k4, v4, params, num_heads=num_heads,
                               mask=True, q_block=8, kv_block=8))
    ref4 = attention_layer_ref(q4, k4, v4, params, num_heads=num_heads, mask=True)
    assert jnp.allclose(out4, ref4, atol=2e-2, rtol=2e-2), \
        "flash-tiled cross-attention mismatch vs reference"

    print("KERNEL_OK")
</pallas_src>

<mosaic_0001>
module attributes {stable_mosaic.version = 11 : i64} {
  func.func @_proj_heads_kernel(%arg0: i32, %arg1: i32, %arg2: memref<16x32xf32, #tpu.memory_space<vmem>>, %arg3: memref<16x32xf32, #tpu.memory_space<vmem>>, %arg4: memref<16x32xf32, #tpu.memory_space<vmem>>, %arg5: memref<32x32xf32, #tpu.memory_space<vmem>>, %arg6: memref<32x32xf32, #tpu.memory_space<vmem>>, %arg7: memref<32x32xf32, #tpu.memory_space<vmem>>, %arg8: memref<1x32xf32, #tpu.memory_space<vmem>>, %arg9: memref<1x32xf32, #tpu.memory_space<vmem>>, %arg10: memref<1x32xf32, #tpu.memory_space<vmem>>, %arg11: memref<8x16x4xf32, #tpu.memory_space<vmem>>, %arg12: memref<8x16x4xf32, #tpu.memory_space<vmem>>, %arg13: memref<8x16x4xf32, #tpu.memory_space<vmem>>) attributes {dimension_semantics = [#tpu.dimension_semantics<parallel>, #tpu.dimension_semantics<parallel>], iteration_bounds = array<i64: 1, 1>, scalar_prefetch = 0 : i64, scratch_operands = 0 : i64, tpu.core_type = #tpu.core_type<tc>, window_params = [{transform_indices = @transform_0, window_bounds = array<i64: 16, 32>}, {transform_indices = @transform_1, window_bounds = array<i64: 16, 32>}, {transform_indices = @transform_2, window_bounds = array<i64: 16, 32>}, {transform_indices = @transform_3, window_bounds = array<i64: 32, 32>}, {transform_indices = @transform_4, window_bounds = array<i64: 32, 32>}, {transform_indices = @transform_5, window_bounds = array<i64: 32, 32>}, {transform_indices = @transform_6, window_bounds = array<i64: 1, 32>}, {transform_indices = @transform_7, window_bounds = array<i64: 1, 32>}, {transform_indices = @transform_8, window_bounds = array<i64: 1, 32>}, {transform_indices = @transform_9, window_bounds = array<i64: 8, 16, 4>}, {transform_indices = @transform_10, window_bounds = array<i64: 8, 16, 4>}, {transform_indices = @transform_11, window_bounds = array<i64: 8, 16, 4>}]} {
    %c0 = arith.constant 0 : index
    %c0_0 = arith.constant 0 : index
    %0 = vector.load %arg2[%c0, %c0_0] : memref<16x32xf32, #tpu.memory_space<vmem>>, vector<16x32xf32>
    %c0_1 = arith.constant 0 : index
    %c0_2 = arith.constant 0 : index
    %1 = vector.load %arg5[%c0_1, %c0_2] : memref<32x32xf32, #tpu.memory_space<vmem>>, vector<32x32xf32>
    %cst = arith.constant dense<0.000000e+00> : vector<16x32xf32>
    %2 = tpu.matmul %0, %1, %cst {dimension_numbers = #tpu.dot_dimension_numbers<[1], [0], [0], [1], [0, 0, 1, 1], [], []>} : vector<16x32xf32>, vector<32x32xf32>, vector<16x32xf32> -> vector<16x32xf32>
    %c0_3 = arith.constant 0 : index
    %c0_4 = arith.constant 0 : index
    %3 = vector.load %arg8[%c0_3, %c0_4] : memref<1x32xf32, #tpu.memory_space<vmem>>, vector<1x32xf32>
    %4 = vector.broadcast %3 : vector<1x32xf32> to vector<16x32xf32>
    %5 = arith.addf %2, %4 : vector<16x32xf32>
    %cst_5 = arith.constant 5.000000e-01 : f32
    %6 = vector.broadcast %cst_5 : f32 to vector<16x32xf32>
    %7 = arith.mulf %5, %6 : vector<16x32xf32>
    %8 = vector.extract_strided_slice %7 {offsets = [0, 0], sizes = [16, 4], strides = [1, 1]} : vector<16x32xf32> to vector<16x4xf32>
    %c0_6 = arith.constant 0 : index
    %c0_7 = arith.constant 0 : index
    %c0_8 = arith.constant 0 : index
    %9 = vector.load %arg11[%c0_6, %c0_7, %c0_8] : memref<8x16x4xf32, #tpu.memory_space<vmem>>, vector<1x16x4xf32>
    %10 = vector.shape_cast %9 : vector<1x16x4xf32> to vector<16x4xf32>
    %11 = vector.shape_cast %8 : vector<16x4xf32> to vector<1x16x4xf32>
    tpu.vector_store %arg11[%c0_6, %c0_7, %c0_8], %11 {strides = array<i32>} : memref<8x16x4xf32, #tpu.memory_space<vmem>>, vector<1x16x4xf32>,
    %12 = vector.extract_strided_slice %7 {offsets = [0, 4], sizes = [16, 4], strides = [1, 1]} : vector<16x32xf32> to vector<16x4xf32>
    %c1 = arith.constant 1 : index
    %c0_9 = arith.constant 0 : index
    %c0_10 = arith.constant 0 : index
    %13 = vector.load %arg11[%c1, %c0_9, %c0_10] : memref<8x16x4xf32, #tpu.memory_space<vmem>>, vector<1x16x4xf32>
    %14 = vector.shape_cast %13 : vector<1x16x4xf32> to vector<16x4xf32>
    %15 = vector.shape_cast %12 : vector<16x4xf32> to vector<1x16x4xf32>
    tpu.vector_store %arg11[%c1, %c0_9, %c0_10], %15 {strides = array<i32>} : memref<8x16x4xf32, #tpu.memory_space<vmem>>, vector<1x16x4xf32>,
    %16 = vector.extract_strided_slice %7 {offsets = [0, 8], sizes = [16, 4], strides = [1, 1]} : vector<16x32xf32> to vector<16x4xf32>
    %c2 = arith.constant 2 : index
    %c0_11 = arith.constant 0 : index
    %c0_12 = arith.constant 0 : index
    %17 = vector.load %arg11[%c2, %c0_11, %c0_12] : memref<8x16x4xf32, #tpu.memory_space<vmem>>, vector<1x16x4xf32>
    %18 = vector.shape_cast %17 : vector<1x16x4xf32> to vector<16x4xf32>
    %19 = vector.shape_cast %16 : vector<16x4xf32> to vector<1x16x4xf32>
    tpu.vector_store %arg11[%c2, %c0_11, %c0_12], %19 {strides = array<i32>} : memref<8x16x4xf32, #tpu.memory_space<vmem>>, vector<1x16x4xf32>,
    %20 = vector.extract_strided_slice %7 {offsets = [0, 12], sizes = [16, 4], strides = [1, 1]} : vector<16x32xf32> to vector<16x4xf32>
    %c3 = arith.constant 3 : index
    %c0_13 = arith.constant 0 : index
    %c0_14 = arith.constant 0 : index
    %21 = vector.load %arg11[%c3, %c0_13, %c0_14] : memref<8x16x4xf32, #tpu.memory_space<vmem>>, vector<1x16x4xf32>
    %22 = vector.shape_cast %21 : vector<1x16x4xf32> to vector<16x4xf32>
    %23 = vector.shape_cast %20 : vector<16x4xf32> to vector<1x16x4xf32>
    tpu.vector_store %arg11[%c3, %c0_13, %c0_14], %23 {strides = array<i32>} : memref<8x16x4xf32, #tpu.memory_space<vmem>>, vector<1x16x4xf32>,
    %24 = vector.extract_strided_slice %7 {offsets = [0, 16], sizes = [16, 4], strides = [1, 1]} : vector<16x32xf32> to vector<16x4xf32>
    %c4 = arith.constant 4 : index
    %c0_15 = arith.constant 0 : index
    %c0_16 = arith.constant 0 : index
    %25 = vector.load %arg11[%c4, %c0_15, %c0_16] : memref<8x16x4xf32, #tpu.memory_space<vmem>>, vector<1x16x4xf32>
    %26 = vector.shape_cast %25 : vector<1x16x4xf32> to vector<16x4xf32>
    %27 = vector.shape_cast %24 : vector<16x4xf32> to vector<1x16x4xf32>
    tpu.vector_store %arg11[%c4, %c0_15, %c0_16], %27 {strides = array<i32>} : memref<8x16x4xf32, #tpu.memory_space<vmem>>, vector<1x16x4xf32>,
    %28 = vector.extract_strided_slice %7 {offsets = [0, 20], sizes = [16, 4], strides = [1, 1]} : vector<16x32xf32> to vector<16x4xf32>
    %c5 = arith.constant 5 : index
    %c0_17 = arith.constant 0 : index
    %c0_18 = arith.constant 0 : index
    %29 = vector.load %arg11[%c5, %c0_17, %c0_18] : memref<8x16x4xf32, #tpu.memory_space<vmem>>, vector<1x16x4xf32>
    %30 = vector.shape_cast %29 : vector<1x16x4xf32> to vector<16x4xf32>
    %31 = vector.shape_cast %28 : vector<16x4xf32> to vector<1x16x4xf32>
    tpu.vector_store %arg11[%c5, %c0_17, %c0_18], %31 {strides = array<i32>} : memref<8x16x4xf32, #tpu.memory_space<vmem>>, vector<1x16x4xf32>,
    %32 = vector.extract_strided_slice %7 {offsets = [0, 24], sizes = [16, 4], strides = [1, 1]} : vector<16x32xf32> to vector<16x4xf32>
    %c6 = arith.constant 6 : index
    %c0_19 = arith.constant 0 : index
    %c0_20 = arith.constant 0 : index
    %33 = vector.load %arg11[%c6, %c0_19, %c0_20] : memref<8x16x4xf32, #tpu.memory_space<vmem>>, vector<1x16x4xf32>
    %34 = vector.shape_cast %33 : vector<1x16x4xf32> to vector<16x4xf32>
    %35 = vector.shape_cast %32 : vector<16x4xf32> to vector<1x16x4xf32>
    tpu.vector_store %arg11[%c6, %c0_19, %c0_20], %35 {strides = array<i32>} : memref<8x16x4xf32, #tpu.memory_space<vmem>>, vector<1x16x4xf32>,
    %36 = vector.extract_strided_slice %7 {offsets = [0, 28], sizes = [16, 4], strides = [1, 1]} : vector<16x32xf32> to vector<16x4xf32>
    %c7 = arith.constant 7 : index
    %c0_21 = arith.constant 0 : index
    %c0_22 = arith.constant 0 : index
    %37 = vector.load %arg11[%c7, %c0_21, %c0_22] : memref<8x16x4xf32, #tpu.memory_space<vmem>>, vector<1x16x4xf32>
    %38 = vector.shape_cast %37 : vector<1x16x4xf32> to vector<16x4xf32>
    %39 = vector.shape_cast %36 : vector<16x4xf32> to vector<1x16x4xf32>
    tpu.vector_store %arg11[%c7, %c0_21, %c0_22], %39 {strides = array<i32>} : memref<8x16x4xf32, #tpu.memory_space<vmem>>, vector<1x16x4xf32>,
    %c0_23 = arith.constant 0 : index
    %c0_24 = arith.constant 0 : index
    %40 = vector.load %arg3[%c0_23, %c0_24] : memref<16x32xf32, #tpu.memory_space<vmem>>, vector<16x32xf32>
    %c0_25 = arith.constant 0 : index
    %c0_26 = arith.constant 0 : index
    %41 = vector.load %arg6[%c0_25, %c0_26] : memref<32x32xf32, #tpu.memory_space<vmem>>, vector<32x32xf32>
    %cst_27 = arith.constant dense<0.000000e+00> : vector<16x32xf32>
    %42 = tpu.matmul %40, %41, %cst_27 {dimension_numbers = #tpu.dot_dimension_numbers<[1], [0], [0], [1], [0, 0, 1, 1], [], []>} : vector<16x32xf32>, vector<32x32xf32>, vector<16x32xf32> -> vector<16x32xf32>
    %c0_28 = arith.constant 0 : index
    %c0_29 = arith.constant 0 : index
    %43 = vector.load %arg9[%c0_28, %c0_29] : memref<1x32xf32, #tpu.memory_space<vmem>>, vector<1x32xf32>
    %44 = vector.broadcast %43 : vector<1x32xf32> to vector<16x32xf32>
    %45 = arith.addf %42, %44 : vector<16x32xf32>
    %46 = vector.extract_strided_slice %45 {offsets = [0, 0], sizes = [16, 4], strides = [1, 1]} : vector<16x32xf32> to vector<16x4xf32>
    %c0_30 = arith.constant 0 : index
    %c0_31 = arith.constant 0 : index
    %c0_32 = arith.constant 0 : index
    %47 = vector.load %arg12[%c0_30, %c0_31, %c0_32] : memref<8x16x4xf32, #tpu.memory_space<vmem>>, vector<1x16x4xf32>
    %48 = vector.shape_cast %47 : vector<1x16x4xf32> to vector<16x4xf32>
    %49 = vector.shape_cast %46 : vector<16x4xf32> to vector<1x16x4xf32>
    tpu.vector_store %arg12[%c0_30, %c0_31, %c0_32], %49 {strides = array<i32>} : memref<8x16x4xf32, #tpu.memory_space<vmem>>, vector<1x16x4xf32>,
    %50 = vector.extract_strided_slice %45 {offsets = [0, 4], sizes = [16, 4], strides = [1, 1]} : vector<16x32xf32> to vector<16x4xf32>
    %c1_33 = arith.constant 1 : index
    %c0_34 = arith.constant 0 : index
    %c0_35 = arith.constant 0 : index
    %51 = vector.load %arg12[%c1_33, %c0_34, %c0_35] : memref<8x16x4xf32, #tpu.memory_space<vmem>>, vector<1x16x4xf32>
    %52 = vector.shape_cast %51 : vector<1x16x4xf32> to vector<16x4xf32>
    %53 = vector.shape_cast %50 : vector<16x4xf32> to vector<1x16x4xf32>
    tpu.vector_store %arg12[%c1_33, %c0_34, %c0_35], %53 {strides = array<i32>} : memref<8x16x4xf32, #tpu.memory_space<vmem>>, vector<1x16x4xf32>,
    %54 = vector.extract_strided_slice %45 {offsets = [0, 8], sizes = [16, 4], strides = [1, 1]} : vector<16x32xf32> to vector<16x4xf32>
    %c2_36 = arith.constant 2 : index
    %c0_37 = arith.constant 0 : index
    %c0_38 = arith.constant 0 : index
    %55 = vector.load %arg12[%c2_36, %c0_37, %c0_38] : memref<8x16x4xf32, #tpu.memory_space<vmem>>, vector<1x16x4xf32>
    %56 = vector.shape_cast %55 : vector<1x16x4xf32> to vector<16x4xf32>
    %57 = vector.shape_cast %54 : vector<16x4xf32> to vector<1x16x4xf32>
    tpu.vector_store %arg12[%c2_36, %c0_37, %c0_38], %57 {strides = array<i32>} : memref<8x16x4xf32, #tpu.memory_space<vmem>>, vector<1x16x4xf32>,
    %58 = vector.extract_strided_slice %45 {offsets = [0, 12], sizes = [16, 4], strides = [1, 1]} : vector<16x32xf32> to vector<16x4xf32>
    %c3_39 = arith.constant 3 : index
    %c0_40 = arith.constant 0 : index
    %c0_41 = arith.constant 0 : index
    %59 = vector.load %arg12[%c3_39, %c0_40, %c0_41] : memref<8x16x4xf32, #tpu.memory_space<vmem>>, vector<1x16x4xf32>
    %60 = vector.shape_cast %59 : vector<1x16x4xf32> to vector<16x4xf32>
    %61 = vector.shape_cast %58 : vector<16x4xf32> to vector<1x16x4xf32>
    tpu.vector_store %arg12[%c3_39, %c0_40, %c0_41], %61 {strides = array<i32>} : memref<8x16x4xf32, #tpu.memory_space<vmem>>, vector<1x16x4xf32>,
    %62 = vector.extract_strided_slice %45 {offsets = [0, 16], sizes = [16, 4], strides = [1, 1]} : vector<16x32xf32> to vector<16x4xf32>
    %c4_42 = arith.constant 4 : index
    %c0_43 = arith.constant 0 : index
    %c0_44 = arith.constant 0 : index
    %63 = vector.load %arg12[%c4_42, %c0_43, %c0_44] : memref<8x16x4xf32, #tpu.memory_space<vmem>>, vector<1x16x4xf32>
    %64 = vector.shape_cast %63 : vector<1x16x4xf32> to vector<16x4xf32>
    %65 = vector.shape_cast %62 : vector<16x4xf32> to vector<1x16x4xf32>
    tpu.vector_store %arg12[%c4_42, %c0_43, %c0_44], %65 {strides = array<i32>} : memref<8x16x4xf32, #tpu.memory_space<vmem>>, vector<1x16x4xf32>,
    %66 = vector.extract_strided_slice %45 {offsets = [0, 20], sizes = [16, 4], strides = [1, 1]} : vector<16x32xf32> to vector<16x4xf32>
    %c5_45 = arith.constant 5 : index
    %c0_46 = arith.constant 0 : index
    %c0_47 = arith.constant 0 : index
    %67 = vector.load %arg12[%c5_45, %c0_46, %c0_47] : memref<8x16x4xf32, #tpu.memory_space<vmem>>, vector<1x16x4xf32>
    %68 = vector.shape_cast %67 : vector<1x16x4xf32> to vector<16x4xf32>
    %69 = vector.shape_cast %66 : vector<16x4xf32> to vector<1x16x4xf32>
    tpu.vector_store %arg12[%c5_45, %c0_46, %c0_47], %69 {strides = array<i32>} : memref<8x16x4xf32, #tpu.memory_space<vmem>>, vector<1x16x4xf32>,
    %70 = vector.extract_strided_slice %45 {offsets = [0, 24], sizes = [16, 4], strides = [1, 1]} : vector<16x32xf32> to vector<16x4xf32>
    %c6_48 = arith.constant 6 : index
    %c0_49 = arith.constant 0 : index
    %c0_50 = arith.constant 0 : index
    %71 = vector.load %arg12[%c6_48, %c0_49, %c0_50] : memref<8x16x4xf32, #tpu.memory_space<vmem>>, vector<1x16x4xf32>
    %72 = vector.shape_cast %71 : vector<1x16x4xf32> to vector<16x4xf32>
    %73 = vector.shape_cast %70 : vector<16x4xf32> to vector<1x16x4xf32>
    tpu.vector_store %arg12[%c6_48, %c0_49, %c0_50], %73 {strides = array<i32>} : memref<8x16x4xf32, #tpu.memory_space<vmem>>, vector<1x16x4xf32>,
    %74 = vector.extract_strided_slice %45 {offsets = [0, 28], sizes = [16, 4], strides = [1, 1]} : vector<16x32xf32> to vector<16x4xf32>
    %c7_51 = arith.constant 7 : index
    %c0_52 = arith.constant 0 : index
    %c0_53 = arith.constant 0 : index
    %75 = vector.load %arg12[%c7_51, %c0_52, %c0_53] : memref<8x16x4xf32, #tpu.memory_space<vmem>>, vector<1x16x4xf32>
    %76 = vector.shape_cast %75 : vector<1x16x4xf32> to vector<16x4xf32>
    %77 = vector.shape_cast %74 : vector<16x4xf32> to vector<1x16x4xf32>
    tpu.vector_store %arg12[%c7_51, %c0_52, %c0_53], %77 {strides = array<i32>} : memref<8x16x4xf32, #tpu.memory_space<vmem>>, vector<1x16x4xf32>,
    %c0_54 = arith.constant 0 : index
    %c0_55 = arith.constant 0 : index
    %78 = vector.load %arg4[%c0_54, %c0_55] : memref<16x32xf32, #tpu.memory_space<vmem>>, vector<16x32xf32>
    %c0_56 = arith.constant 0 : index
    %c0_57 = arith.constant 0 : index
    %79 = vector.load %arg7[%c0_56, %c0_57] : memref<32x32xf32, #tpu.memory_space<vmem>>, vector<32x32xf32>
    %cst_58 = arith.constant dense<0.000000e+00> : vector<16x32xf32>
    %80 = tpu.matmul %78, %79, %cst_58 {dimension_numbers = #tpu.dot_dimension_numbers<[1], [0], [0], [1], [0, 0, 1, 1], [], []>} : vector<16x32xf32>, vector<32x32xf32>, vector<16x32xf32> -> vector<16x32xf32>
    %c0_59 = arith.constant 0 : index
    %c0_60 = arith.constant 0 : index
    %81 = vector.load %arg10[%c0_59, %c0_60] : memref<1x32xf32, #tpu.memory_space<vmem>>, vector<1x32xf32>
    %82 = vector.broadcast %81 : vector<1x32xf32> to vector<16x32xf32>
    %83 = arith.addf %80, %82 : vector<16x32xf32>
    %84 = vector.extract_strided_slice %83 {offsets = [0, 0], sizes = [16, 4], strides = [1, 1]} : vector<16x32xf32> to vector<16x4xf32>
    %c0_61 = arith.constant 0 : index
    %c0_62 = arith.constant 0 : index
    %c0_63 = arith.constant 0 : index
    %85 = vector.load %arg13[%c0_61, %c0_62, %c0_63] : memref<8x16x4xf32, #tpu.memory_space<vmem>>, vector<1x16x4xf32>
    %86 = vector.shape_cast %85 : vector<1x16x4xf32> to vector<16x4xf32>
    %87 = vector.shape_cast %84 : vector<16x4xf32> to vector<1x16x4xf32>
    tpu.vector_store %arg13[%c0_61, %c0_62, %c0_63], %87 {strides = array<i32>} : memref<8x16x4xf32, #tpu.memory_space<vmem>>, vector<1x16x4xf32>,
    %88 = vector.extract_strided_slice %83 {offsets = [0, 4], sizes = [16, 4], strides = [1, 1]} : vector<16x32xf32> to vector<16x4xf32>
    %c1_64 = arith.constant 1 : index
    %c0_65 = arith.constant 0 : index
    %c0_66 = arith.constant 0 : index
    %89 = vector.load %arg13[%c1_64, %c0_65, %c0_66] : memref<8x16x4xf32, #tpu.memory_space<vmem>>, vector<1x16x4xf32>
    %90 = vector.shape_cast %89 : vector<1x16x4xf32> to vector<16x4xf32>
    %91 = vector.shape_cast %88 : vector<16x4xf32> to vector<1x16x4xf32>
    tpu.vector_store %arg13[%c1_64, %c0_65, %c0_66], %91 {strides = array<i32>} : memref<8x16x4xf32, #tpu.memory_space<vmem>>, vector<1x16x4xf32>,
    %92 = vector.extract_strided_slice %83 {offsets = [0, 8], sizes = [16, 4], strides = [1, 1]} : vector<16x32xf32> to vector<16x4xf32>
    %c2_67 = arith.constant 2 : index
    %c0_68 = arith.constant 0 : index
    %c0_69 = arith.constant 0 : index
    %93 = vector.load %arg13[%c2_67, %c0_68, %c0_69] : memref<8x16x4xf32, #tpu.memory_space<vmem>>, vector<1x16x4xf32>
    %94 = vector.shape_cast %93 : vector<1x16x4xf32> to vector<16x4xf32>
    %95 = vector.shape_cast %92 : vector<16x4xf32> to vector<1x16x4xf32>
    tpu.vector_store %arg13[%c2_67, %c0_68, %c0_69], %95 {strides = array<i32>} : memref<8x16x4xf32, #tpu.memory_space<vmem>>, vector<1x16x4xf32>,
    %96 = vector.extract_strided_slice %83 {offsets = [0, 12], sizes = [16, 4], strides = [1, 1]} : vector<16x32xf32> to vector<16x4xf32>
    %c3_70 = arith.constant 3 : index
    %c0_71 = arith.constant 0 : index
    %c0_72 = arith.constant 0 : index
    %97 = vector.load %arg13[%c3_70, %c0_71, %c0_72] : memref<8x16x4xf32, #tpu.memory_space<vmem>>, vector<1x16x4xf32>
    %98 = vector.shape_cast %97 : vector<1x16x4xf32> to vector<16x4xf32>
    %99 = vector.shape_cast %96 : vector<16x4xf32> to vector<1x16x4xf32>
    tpu.vector_store %arg13[%c3_70, %c0_71, %c0_72], %99 {strides = array<i32>} : memref<8x16x4xf32, #tpu.memory_space<vmem>>, vector<1x16x4xf32>,
    %100 = vector.extract_strided_slice %83 {offsets = [0, 16], sizes = [16, 4], strides = [1, 1]} : vector<16x32xf32> to vector<16x4xf32>
    %c4_73 = arith.constant 4 : index
    %c0_74 = arith.constant 0 : index
    %c0_75 = arith.constant 0 : index
    %101 = vector.load %arg13[%c4_73, %c0_74, %c0_75] : memref<8x16x4xf32, #tpu.memory_space<vmem>>, vector<1x16x4xf32>
    %102 = vector.shape_cast %101 : vector<1x16x4xf32> to vector<16x4xf32>
    %103 = vector.shape_cast %100 : vector<16x4xf32> to vector<1x16x4xf32>
    tpu.vector_store %arg13[%c4_73, %c0_74, %c0_75], %103 {strides = array<i32>} : memref<8x16x4xf32, #tpu.memory_space<vmem>>, vector<1x16x4xf32>,
    %104 = vector.extract_strided_slice %83 {offsets = [0, 20], sizes = [16, 4], strides = [1, 1]} : vector<16x32xf32> to vector<16x4xf32>
    %c5_76 = arith.constant 5 : index
    %c0_77 = arith.constant 0 : index
    %c0_78 = arith.constant 0 : index
    %105 = vector.load %arg13[%c5_76, %c0_77, %c0_78] : memref<8x16x4xf32, #tpu.memory_space<vmem>>, vector<1x16x4xf32>
    %106 = vector.shape_cast %105 : vector<1x16x4xf32> to vector<16x4xf32>
    %107 = vector.shape_cast %104 : vector<16x4xf32> to vector<1x16x4xf32>
    tpu.vector_store %arg13[%c5_76, %c0_77, %c0_78], %107 {strides = array<i32>} : memref<8x16x4xf32, #tpu.memory_space<vmem>>, vector<1x16x4xf32>,
    %108 = vector.extract_strided_slice %83 {offsets = [0, 24], sizes = [16, 4], strides = [1, 1]} : vector<16x32xf32> to vector<16x4xf32>
    %c6_79 = arith.constant 6 : index
    %c0_80 = arith.constant 0 : index
    %c0_81 = arith.constant 0 : index
    %109 = vector.load %arg13[%c6_79, %c0_80, %c0_81] : memref<8x16x4xf32, #tpu.memory_space<vmem>>, vector<1x16x4xf32>
    %110 = vector.shape_cast %109 : vector<1x16x4xf32> to vector<16x4xf32>
    %111 = vector.shape_cast %108 : vector<16x4xf32> to vector<1x16x4xf32>
    tpu.vector_store %arg13[%c6_79, %c0_80, %c0_81], %111 {strides = array<i32>} : memref<8x16x4xf32, #tpu.memory_space<vmem>>, vector<1x16x4xf32>,
    %112 = vector.extract_strided_slice %83 {offsets = [0, 28], sizes = [16, 4], strides = [1, 1]} : vector<16x32xf32> to vector<16x4xf32>
    %c7_82 = arith.constant 7 : index
    %c0_83 = arith.constant 0 : index
    %c0_84 = arith.constant 0 : index
    %113 = vector.load %arg13[%c7_82, %c0_83, %c0_84] : memref<8x16x4xf32, #tpu.memory_space<vmem>>, vector<1x16x4xf32>
    %114 = vector.shape_cast %113 : vector<1x16x4xf32> to vector<16x4xf32>
    %115 = vector.shape_cast %112 : vector<16x4xf32> to vector<1x16x4xf32>
    tpu.vector_store %arg13[%c7_82, %c0_83, %c0_84], %115 {strides = array<i32>} : memref<8x16x4xf32, #tpu.memory_space<vmem>>, vector<1x16x4xf32>,
    return
  }
  func.func @transform_0(%arg0: i32, %arg1: i32) -> (i32, i32) {
    %c0_i32 = arith.constant 0 : i32
    %c0_i32_0 = arith.constant 0 : i32
    return %arg0, %c0_i32 : i32, i32
  }
  func.func @transform_1(%arg0: i32, %arg1: i32) -> (i32, i32) {
    %c0_i32 = arith.constant 0 : i32
    %c0_i32_0 = arith.constant 0 : i32
    return %arg0, %c0_i32 : i32, i32
  }
  func.func @transform_2(%arg0: i32, %arg1: i32) -> (i32, i32) {
    %c0_i32 = arith.constant 0 : i32
    %c0_i32_0 = arith.constant 0 : i32
    return %arg0, %c0_i32 : i32, i32
  }
  func.func @transform_3(%arg0: i32, %arg1: i32) -> (i32, i32) {
    %c0_i32 = arith.constant 0 : i32
    %c0_i32_0 = arith.constant 0 : i32
    return %c0_i32, %arg1 : i32, i32
  }
  func.func @transform_4(%arg0: i32, %arg1: i32) -> (i32, i32) {
    %c0_i32 = arith.constant 0 : i32
    %c0_i32_0 = arith.constant 0 : i32
    return %c0_i32, %arg1 : i32, i32
  }
  func.func @transform_5(%arg0: i32, %arg1: i32) -> (i32, i32) {
    %c0_i32 = arith.constant 0 : i32
    %c0_i32_0 = arith.constant 0 : i32
    return %c0_i32, %arg1 : i32, i32
  }
  func.func @transform_6(%arg0: i32, %arg1: i32) -> (i32, i32) {
    %c0_i32 = arith.constant 0 : i32
    %c0_i32_0 = arith.constant 0 : i32
    return %c0_i32, %arg1 : i32, i32
  }
  func.func @transform_7(%arg0: i32, %arg1: i32) -> (i32, i32) {
    %c0_i32 = arith.constant 0 : i32
    %c0_i32_0 = arith.constant 0 : i32
    return %c0_i32, %arg1 : i32, i32
  }
  func.func @transform_8(%arg0: i32, %arg1: i32) -> (i32, i32) {
    %c0_i32 = arith.constant 0 : i32
    %c0_i32_0 = arith.constant 0 : i32
    return %c0_i32, %arg1 : i32, i32
  }
  func.func @transform_9(%arg0: i32, %arg1: i32) -> (i32, i32, i32) {
    %c0_i32 = arith.constant 0 : i32
    %c0_i32_0 = arith.constant 0 : i32
    return %arg1, %arg0, %c0_i32 : i32, i32, i32
  }
  func.func @transform_10(%arg0: i32, %arg1: i32) -> (i32, i32, i32) {
    %c0_i32 = arith.constant 0 : i32
    %c0_i32_0 = arith.constant 0 : i32
    return %arg1, %arg0, %c0_i32 : i32, i32, i32
  }
  func.func @transform_11(%arg0: i32, %arg1: i32) -> (i32, i32, i32) {
    %c0_i32 = arith.constant 0 : i32
    %c0_i32_0 = arith.constant 0 : i32
    return %arg1, %arg0, %c0_i32 : i32, i32, i32
  }
}

</mosaic_0001>

<bundles_post_ra>
// kernel: tpu_custom_call.1
= control target key start
LH: loop header
LB: loop body
LE: loop exit
PB: predicated region body
PF: predicated region fallthrough
CT: control target
= control target key end

     0   :  { %17 = vsyncpa [#allocation3], 0  ;;  %s1330_s0 = inlined_call_operand.hbm [shape: f32[16,32], index: 0, kind: input, shape index: {}]   ;;  %s1331_s1 = inlined_call_operand.hbm [shape: f32[16,32], index: 1, kind: input, shape index: {}]   ;;  %s1332_s2 = inlined_call_operand.hbm [shape: f32[16,32], index: 2, kind: input, shape index: {}]   ;;  %s1333_s3 = inlined_call_operand.hbm [shape: f32[32,32], index: 3, kind: input, shape index: {}]   ;;  %s1334_s4 = inlined_call_operand.hbm [shape: f32[32,32], index: 4, kind: input, shape index: {}]   ;;  %s1335_s5 = inlined_call_operand.hbm [shape: f32[32,32], index: 5, kind: input, shape index: {}]   ;;  %s1336_s6 = inlined_call_operand.vmem [shape: f32[1,32], index: 6, kind: input, shape index: {}]   ;;  %s1337_s7 = inlined_call_operand.vmem [shape: f32[1,32], index: 7, kind: input, shape index: {}]   ;;  %s1338_s8 = inlined_call_operand.vmem [shape: f32[1,32], index: 8, kind: input, shape index: {}]   ;;  %s1339_s9 = inlined_call_operand.vmem [shape: f32[8,16,4], index: 9, kind: output, shape index: {0}]   ;;  %s1340_s10 = inlined_call_operand.vmem [shape: f32[8,16,4], index: 10, kind: output, shape index: {1}]   ;;  %s1341_s11 = inlined_call_operand.vmem [shape: f32[8,16,4], index: 11, kind: output, shape index: {2}]  }
   0x1   :  { %18 = vsyncpa [#allocation5], 0 }
   0x2   :  { %19 = vsyncpa [#allocation8], 0 }
   0x3   :  { %20 = vsyncpa [#allocation11], 0  ;;  %s901_s17 = smov [#allocation4]   ;;  %s902_s19 = smov [#allocation7]  }
   0x4   :  { %s38_s18 = sshll.u32 %s901_s17, 4  ;;  %s62_s20 = sshll.u32 %s902_s19, 4  ;;  %s39_s18 = int_to_ptr.vmem [resolvable:$true] %s38_s18  ;;  %s976_s20 = int_to_ptr.vmem [resolvable:$true] %s62_s20 }
   0x5   :  { %s761_s23 = scalar_lea.hbm %s1331_s1, 256 }
   0x6   :  { %p762_p0 = scmp.ne.s32.totalorder %s1331_s1, %s761_s23  ;;  %p765_p1 = scmp.lt.u32.totalorder %s761_s23, %s1331_s1 }
   0x8   :  { %p767_p2 = pnand %p765_p1, %p762_p0 }
   0xa   :  { %770 = shalt.err (!%p767_p2)
}
   0xb   :  { %s771_s28 = scalar_lea.vmem %s39_s18, 256  ;;  %p776_p4 = scmp.lt.s32.totalorder %s39_s18, %s39_s18 }
   0xc   :  { %p772_p3 = scmp.ne.s32.totalorder %s39_s18, %s771_s28  ;;  %p777_p5 = scmp.lt.s32.totalorder %s771_s28, %s771_s28 }
   0xe   :  { %p778_p6 = por %p777_p5, %p776_p4 }
  0x10   :  { %p779_p7 = pnand %p778_p6, %p772_p3 }
  0x12   :  { %782 = shalt.err (!%p779_p7)
}
  0x13   :  { %s903_s29 = smov 128   ;;  %s904_s30 = smov 8  }
  0x14   :  { %44 = dma.hbm_to_vmem [thread:$0]  %s1331_s1, 256, %s39_s18, [#allocation5], %s903_s29, %s903_s29, %s904_s30  }
  0x15   :  { %s783_s16 = scalar_lea.hbm %s1333_s3, 512 }
  0x16   :  { %p784_p8 = scmp.ne.s32.totalorder %s1333_s3, %s783_s16  ;;  %p787_p9 = scmp.lt.u32.totalorder %s783_s16, %s1333_s3 }
  0x18   :  { %p789_p10 = pnand %p787_p9, %p784_p8 }
  0x1a   :  { %792 = shalt.err (!%p789_p10)
}
  0x1b   :  { %s793_s23 = scalar_lea.vmem %s976_s20, 512  ;;  %p798_p12 = scmp.lt.s32.totalorder %s976_s20, %s976_s20 }
  0x1c   :  { %p794_p11 = scmp.ne.s32.totalorder %s976_s20, %s793_s23  ;;  %p799_p13 = scmp.lt.s32.totalorder %s793_s23, %s793_s23 }
  0x1e   :  { %p800_p0 = por %p799_p13, %p798_p12 }
  0x20   :  { %p801_p1 = pnand %p800_p0, %p794_p11 }
  0x22   :  { %804 = shalt.err (!%p801_p1)
}
  0x23   :  { %68 = dma.hbm_to_vmem [thread:$0]  %s1333_s3, 512, %s976_s20, [#allocation8], %s903_s29, %s903_s29, %s904_s30  }
  0x24   :  { %s905_s24 = smov [#allocation2]   ;;  %s906_s26 = smov [#allocation6]  }
  0x25   :  { %s26_s25 = sshll.u32 %s905_s24, 4  ;;  %s50_s27 = sshll.u32 %s906_s26, 4  ;;  %s27_s25 = int_to_ptr.vmem [resolvable:$true] %s26_s25  ;;  %s1013_s27 = int_to_ptr.vmem [resolvable:$true] %s50_s27 }
  0x26   :  { %s805_s13 = scalar_lea.hbm %s1330_s0, 256 }
  0x27   :  { %p806_p2 = scmp.ne.s32.totalorder %s1330_s0, %s805_s13  ;;  %p809_p3 = scmp.lt.u32.totalorder %s805_s13, %s1330_s0 }
  0x29   :  { %p811_p4 = pnand %p809_p3, %p806_p2 }
  0x2b   :  { %814 = shalt.err (!%p811_p4)
}
  0x2c   :  { %s815_s3 = scalar_lea.vmem %s27_s25, 256  ;;  %p820_p6 = scmp.lt.s32.totalorder %s27_s25, %s27_s25 }
  0x2d   :  { %p816_p5 = scmp.ne.s32.totalorder %s27_s25, %s815_s3  ;;  %p821_p7 = scmp.lt.s32.totalorder %s815_s3, %s815_s3 }
  0x2f   :  { %p822_p8 = por %p821_p7, %p820_p6 }
  0x31   :  { %p823_p9 = pnand %p822_p8, %p816_p5 }
  0x33   :  { %826 = shalt.err (!%p823_p9)
}
  0x34   :  { %32 = dma.hbm_to_vmem [thread:$0]  %s1330_s0, 256, %s27_s25, [#allocation3], %s903_s29, %s903_s29, %s904_s30  }
  0x35   :  { %s827_s23 = scalar_lea.hbm %s1332_s2, 256 }
  0x36   :  { %p828_p10 = scmp.ne.s32.totalorder %s1332_s2, %s827_s23  ;;  %p831_p11 = scmp.lt.u32.totalorder %s827_s23, %s1332_s2 }
  0x38   :  { %p833_p12 = pnand %p831_p11, %p828_p10 }
  0x3a   :  { %836 = shalt.err (!%p833_p12)
}
  0x3b   :  { %s837_s28 = scalar_lea.vmem %s1013_s27, 256  ;;  %p842_p0 = scmp.lt.s32.totalorder %s1013_s27, %s1013_s27 }
  0x3c   :  { %p838_p13 = scmp.ne.s32.totalorder %s1013_s27, %s837_s28  ;;  %p843_p1 = scmp.lt.s32.totalorder %s837_s28, %s837_s28 }
  0x3e   :  { %p844_p2 = por %p843_p1, %p842_p0 }
  0x40   :  { %p845_p3 = pnand %p844_p2, %p838_p13 }
  0x42   :  { %848 = shalt.err (!%p845_p3)
}
  0x43   :  { %56 = dma.hbm_to_vmem [thread:$0]  %s1332_s2, 256, %s1013_s27, [#allocation5], %s903_s29, %s903_s29, %s904_s30  }
  0x44   :  { %s907_s12 = smov [#allocation9]   ;;  %s908_s14 = smov [#allocation10]  }
  0x45   :  { %s74_s13 = sshll.u32 %s907_s12, 4  ;;  %s86_s15 = sshll.u32 %s908_s14, 4  ;;  %s75_s13 = int_to_ptr.vmem [resolvable:$true] %s74_s13  ;;  %s1050_s15 = int_to_ptr.vmem [resolvable:$true] %s86_s15 }
  0x46   :  { %s849_s3 = scalar_lea.hbm %s1334_s4, 512 }
  0x47   :  { %p850_p4 = scmp.ne.s32.totalorder %s1334_s4, %s849_s3  ;;  %p853_p5 = scmp.lt.u32.totalorder %s849_s3, %s1334_s4 }
  0x49   :  { %p855_p6 = pnand %p853_p5, %p850_p4 }
  0x4b   :  { %858 = shalt.err (!%p855_p6)
}
  0x4c   :  { %s859_s2 = scalar_lea.vmem %s75_s13, 512  ;;  %p864_p8 = scmp.lt.s32.totalorder %s75_s13, %s75_s13 }
  0x4d   :  { %p860_p7 = scmp.ne.s32.totalorder %s75_s13, %s859_s2  ;;  %p865_p9 = scmp.lt.s32.totalorder %s859_s2, %s859_s2 }
  0x4f   :  { %p866_p10 = por %p865_p9, %p864_p8 }
  0x51   :  { %p867_p11 = pnand %p866_p10, %p860_p7 }
  0x53   :  { %870 = shalt.err (!%p867_p11)
}
  0x54   :  { %80 = dma.hbm_to_vmem [thread:$0]  %s1334_s4, 512, %s75_s13, [#allocation8], %s903_s29, %s903_s29, %s904_s30  }
  0x55   :  { %s871_s24 = scalar_lea.hbm %s1335_s5, 512 }
  0x56   :  { %p872_p12 = scmp.ne.s32.totalorder %s1335_s5, %s871_s24  ;;  %p875_p13 = scmp.lt.u32.totalorder %s871_s24, %s1335_s5 }
  0x58   :  { %p877_p0 = pnand %p875_p13, %p872_p12 }
  0x5a   :  { %880 = shalt.err (!%p877_p0)
}
  0x5b   :  { %s881_s12 = scalar_lea.vmem %s1050_s15, 512  ;;  %p886_p2 = scmp.lt.s32.totalorder %s1050_s15, %s1050_s15 }
  0x5c   :  { %p882_p1 = scmp.ne.s32.totalorder %s1050_s15, %s881_s12  ;;  %p887_p3 = scmp.lt.s32.totalorder %s881_s12, %s881_s12 }
  0x5e   :  { %p888_p4 = por %p887_p3, %p886_p2 }
  0x60   :  { %p889_p5 = pnand %p888_p4, %p882_p1 }
  0x62   :  { %892 = shalt.err (!%p889_p5)
}
  0x63   :  { %92 = dma.hbm_to_vmem [thread:$0]  %s1335_s5, 512, %s1050_s15, [#allocation11], %s903_s29, %s903_s29, %s904_s30  }
  0x64   :  { %893 = dma.done.wait [#allocation3], 256  }
  0x65   :  { %894 = vsyncadd [#allocation3], 4294967040 }
  0x66   :  { %895 = dma.done.wait [#allocation5], 512  }
  0x67   :  { %896 = vsyncadd [#allocation5], 4294966784 }
  0x68   :  { %897 = dma.done.wait [#allocation8], 1024  }
  0x69   :  { %898 = vsyncadd [#allocation8], 4294966272 }
  0x6a   :  { %899 = dma.done.wait [#allocation11], 512  }
  0x6b   :  { %900 = vsyncadd [#allocation11], 4294966784  ;;  %vm130_vm0 = vcmask 261120   ;;  %v284_v0 = vld [vmem:[#allocation9] sm:$0xff]  ;;  %v285_v1 = vld [vmem:[#allocation9 + $0x8] sm:$0xff]  ;;  %vm214_vm1 = vcmask 31744  }
  0x6c   :  { %v286_v2 = vld [vmem:[#allocation9 + $0x10] sm:$0xff]  ;;  %v730_v3 = vpack.c.bf16 %v285_v1, %v284_v0  ;;  %v287_v4 = vld [vmem:[#allocation9 + $0x18] sm:$0xff]  ;;  %v282_v5 = vld [vmem:[#allocation4] sm:$0xff]  ;;  %s909_s17 = smov 124   ;;  %s911_s23 = smov 116  }
  0x6d   :  { %v734_v6 = vpack.c.bf16 %v287_v4, %v286_v2  ;;  %708 = vmatprep.mubr.msk.f32.mxu1 %vm130_vm0, %v282_v5  ;;  %v119_v7 = vld [vmem:[#allocation7] sm:$0xff]  ;;  %v120_v8 = vld [vmem:[#allocation7 + $0x8] sm:$0xff]  ;;  %v121_v9 = vld [vmem:[#allocation7 + $0x10] sm:$0xff]  ;;  %s913_s28 = smov 108   ;;  %s914_s0 = smov 104  }
  0x6e   :  { %731 = vmatprep.subr.bf16.mxu1 %v730_v3  ;;  %v722_v10 = vpack.c.bf16 %v120_v8, %v119_v7  ;;  %v122_v11 = vld [vmem:[#allocation7 + $0x18] sm:$0xff]  ;;  %v117_v12 = vld [vmem:[#allocation2] sm:$0xff]  ;;  %v445_v14 = vld [vmem:[#allocation10] sm:$0xff]  ;;  %s915_s25 = smov 100  }
  0x6f   :  { %733 = vmatpush3.bf16.msra.mxu1 %v730_v3  ;;  %v726_v13 = vpack.c.bf16 %v122_v11, %v121_v9  ;;  %697 = vmatprep.mubr.msk.f32.mxu0 %vm130_vm0, %v117_v12  ;;  %v446_v15 = vld [vmem:[#allocation10 + $0x8] sm:$0xff]  ;;  %v447_v18 = vld [vmem:[#allocation10 + $0x10] sm:$0xff]  ;;  %v448_v19 = vld [vmem:[#allocation10 + $0x18] sm:$0xff] }
  0x70   :  { %735 = vmatprep.subr.bf16.mxu1 %v734_v6  ;;  %723 = vmatprep.subr.bf16.mxu0 %v722_v10  ;;  %v738_v16 = vpack.c.bf16 %v446_v15, %v445_v14  ;;  %v283_v17 = vld [vmem:[#allocation4 + $0x8] sm:$0xff]  ;;  %v118_v20 = vld [vmem:[#allocation2 + $0x8] sm:$0xff]  ;;  %v742_v21 = vpack.c.bf16 %v448_v19, %v447_v18  ;;  %v443_v22 = vld [vmem:[#allocation6] sm:$0xff] }
  0x71   :  { %725 = vmatpush3.bf16.msra.mxu0 %v722_v10  ;;  %v444_v23 = vld [vmem:[#allocation6 + $0x8] sm:$0xff]  ;;  %v637_v24 = vld [vmem:[%s1337_s7] ss:$0 sm:$0xff] }
  0x72   :  { %727 = vmatprep.subr.bf16.mxu0 %v726_v13  ;;  %v620_v26 = vld [vmem:[%s1336_s6] ss:$0 sm:$0xff]  ;;  %s910_s6 = smov 120  }
  0x73   :  { %737 = vmatpush3.bf16.msra.mxu1 %v734_v6  ;;  %v654_v36 = vld [vmem:[%s1338_s8] ss:$0 sm:$0xff]  ;;  %s912_s8 = smov 112  }
  0x75   :  { %729 = vmatpush3.bf16.msra.mxu0 %v726_v13 }
  0x76   :  { %709 = vmatmul.mubr.msk.f32.vlgmr.msra.gmra.mrb[0].mxu1 %vm130_vm0, %v283_v17  ;;  %739 = vmatprep.subr.bf16.mxu0 %v738_v16 }
  0x78   :  { %698 = vmatmul.mubr.msk.f32.vlgmr.msra.gmra.mrb[0].mxu0 %vm130_vm0, %v118_v20 }
  0x79   :  { %741 = vmatpush3.bf16.msra.mxu0 %v738_v16  ;;  %719 = vmatprep.mubr.msk.f32.mxu0 %vm130_vm0, %v443_v22 }
  0x7a   :  { %743 = vmatprep.subr.bf16.mxu0 %v742_v21 }
  0x7d   :  { %745 = vmatpush3.bf16.msra.mxu0 %v742_v21 }
  0x80   :  { %720 = vmatmul.mubr.msk.f32.vlgmr.msra.gmra.mrb[2].mxu0 %vm130_vm0, %v444_v23 }
 0x149   :  { %v710_v25 = vpop.f32.mrb[0].mxu1 }
 0x14a   :  { %v373_v27 = vadd.f32 %v710_v25, %v637_v24  ;;  %v367_v28 = vpop.f32.mrb[1].mxu1 }
 0x14b   :  { %v368_v29 = vadd.f32 %v637_v24, %v367_v28  ;;  %v699_v30 = vpop.f32.mrb[0].mxu0 }
 0x14c   :  { %377 = vst.msk [vmem:[%s1340_s10 + $0x8] sm:$0xff] %vm214_vm1, %v373_v27  ;;  %382 = vrot.lane.b32.xlu1 %v373_v27, %s909_s17  ;;  %v209_v31 = vadd.f32 %v699_v30, %v620_v26  ;;  %v203_v32 = vpop.f32.mrb[1].mxu0 }
 0x14d   :  { %376 = vst.msk [vmem:[%s1340_s10] sm:$0xff] %vm214_vm1, %v368_v29  ;;  %380 = vrot.lane.b32.xlu0 %v368_v29, %s909_s17  ;;  %v204_v33 = vadd.f32 %v620_v26, %v203_v32 }
 0x14e   :  { %v213_v34 = vmul.f32 0.5, %v209_v31 }
 0x14f   :  { %v212_v35 = vmul.f32 0.5, %v204_v33 }
 0x150   :  { %391 = vrot.lane.b32.xlu1 %v373_v27, %s910_s6  ;;  %216 = vst.msk [vmem:[%s1339_s9 + $0x8] sm:$0xff] %vm214_vm1, %v213_v34 }
 0x151   :  { %389 = vrot.lane.b32.xlu0 %v368_v29, %s910_s6  ;;  %215 = vst.msk [vmem:[%s1339_s9] sm:$0xff] %vm214_vm1, %v212_v35 }
 0x153   :  { %v721_v37 = vpop.f32.mrb[2].mxu0 }
 0x154   :  { %400 = vrot.lane.b32.xlu1 %v373_v27, %s911_s23  ;;  %v534_v38 = vadd.f32 %v721_v37, %v654_v36  ;;  %v528_v39 = vpop.f32.mrb[3].mxu0 }
 0x155   :  { %398 = vrot.lane.b32.xlu0 %v368_v29, %s911_s23  ;;  %v529_v40 = vadd.f32 %v654_v36, %v528_v39 }
 0x156   :  { %538 = vst.msk [vmem:[%s1341_s11 + $0x8] sm:$0xff] %vm214_vm1, %v534_v38 }
 0x157   :  { %537 = vst.msk [vmem:[%s1341_s11] sm:$0xff] %vm214_vm1, %v529_v40 }
 0x158   :  { %409 = vrot.lane.b32.xlu1 %v373_v27, %s912_s8 }
 0x159   :  { %407 = vrot.lane.b32.xlu0 %v368_v29, %s912_s8 }
 0x15c   :  { %418 = vrot.lane.b32.xlu1 %v373_v27, %s913_s28 }
 0x15d   :  { %416 = vrot.lane.b32.xlu0 %v368_v29, %s913_s28 }
 0x160   :  { %427 = vrot.lane.b32.xlu1 %v373_v27, %s914_s0 }
 0x161   :  { %425 = vrot.lane.b32.xlu0 %v368_v29, %s914_s0 }
 0x164   :  { %436 = vrot.lane.b32.xlu1 %v373_v27, %s915_s25 }
 0x165   :  { %434 = vrot.lane.b32.xlu0 %v368_v29, %s915_s25 }
 0x168   :  { %230 = vrot.lane.b32.xlu1 %v213_v34, %s910_s6 }
 0x169   :  { %221 = vrot.lane.b32.xlu0 %v213_v34, %s909_s17 }
 0x16c   :  { %239 = vrot.lane.b32.xlu1 %v213_v34, %s911_s23 }
 0x16d   :  { %219 = vrot.lane.b32.xlu0 %v212_v35, %s909_s17 }
 0x170   :  { %248 = vrot.lane.b32.xlu1 %v213_v34, %s912_s8 }
 0x171   :  { %237 = vrot.lane.b32.xlu0 %v212_v35, %s911_s23 }
 0x174   :  { %257 = vrot.lane.b32.xlu1 %v213_v34, %s913_s28 }
 0x175   :  { %246 = vrot.lane.b32.xlu0 %v212_v35, %s912_s8 }
 0x178   :  { %266 = vrot.lane.b32.xlu1 %v213_v34, %s914_s0 }
 0x179   :  { %255 = vrot.lane.b32.xlu0 %v212_v35, %s913_s28 }
 0x17c   :  { %275 = vrot.lane.b32.xlu1 %v213_v34, %s915_s25 }
 0x17d   :  { %264 = vrot.lane.b32.xlu0 %v212_v35, %s914_s0 }
 0x180   :  { %228 = vrot.lane.b32.xlu1 %v212_v35, %s910_s6 }
 0x181   :  { %273 = vrot.lane.b32.xlu0 %v212_v35, %s915_s25 }
 0x184   :  { %543 = vrot.lane.b32.xlu1 %v534_v38, %s909_s17 }
 0x185   :  { %541 = vrot.lane.b32.xlu0 %v529_v40, %s909_s17 }
 0x188   :  { %552 = vrot.lane.b32.xlu1 %v534_v38, %s910_s6 }
 0x189   :  { %550 = vrot.lane.b32.xlu0 %v529_v40, %s910_s6 }
 0x18c   :  { %561 = vrot.lane.b32.xlu1 %v534_v38, %s911_s23 }
 0x18d   :  { %559 = vrot.lane.b32.xlu0 %v529_v40, %s911_s23 }
 0x190   :  { %570 = vrot.lane.b32.xlu1 %v534_v38, %s912_s8 }
 0x191   :  { %568 = vrot.lane.b32.xlu0 %v529_v40, %s912_s8 }
 0x194   :  { %579 = vrot.lane.b32.xlu1 %v534_v38, %s913_s28 }
 0x195   :  { %577 = vrot.lane.b32.xlu0 %v529_v40, %s913_s28 }
 0x198   :  { %588 = vrot.lane.b32.xlu1 %v534_v38, %s914_s0 }
 0x199   :  { %586 = vrot.lane.b32.xlu0 %v529_v40, %s914_s0 }
 0x19c   :  { %597 = vrot.lane.b32.xlu1 %v534_v38, %s915_s25 }
 0x19d   :  { %595 = vrot.lane.b32.xlu0 %v529_v40, %s915_s25 }
 0x1be   :  { %v383_v41 = vpop.permute.xlu1 %382 }
 0x1bf   :  { %641 = vst.msk [vmem:[%s1340_s10 + $0x18] sm:$0xff] %vm214_vm1, %v383_v41  ;;  %v381_v42 = vpop.permute.xlu0 %380 }
 0x1c0   :  { %640 = vst.msk [vmem:[%s1340_s10 + $0x10] sm:$0xff] %vm214_vm1, %v381_v42 }
 0x1c2   :  { %v392_v43 = vpop.permute.xlu1 %391 }
 0x1c3   :  { %643 = vst.msk [vmem:[%s1340_s10 + $0x28] sm:$0xff] %vm214_vm1, %v392_v43  ;;  %v390_v44 = vpop.permute.xlu0 %389 }
 0x1c4   :  { %642 = vst.msk [vmem:[%s1340_s10 + $0x20] sm:$0xff] %vm214_vm1, %v390_v44 }
 0x1c6   :  { %v401_v45 = vpop.permute.xlu1 %400 }
 0x1c7   :  { %645 = vst.msk [vmem:[%s1340_s10 + $0x38] sm:$0xff] %vm214_vm1, %v401_v45  ;;  %v399_v46 = vpop.permute.xlu0 %398 }
 0x1c8   :  { %644 = vst.msk [vmem:[%s1340_s10 + $0x30] sm:$0xff] %vm214_vm1, %v399_v46 }
 0x1ca   :  { %v410_v47 = vpop.permute.xlu1 %409 }
 0x1cb   :  { %647 = vst.msk [vmem:[%s1340_s10 + $0x48] sm:$0xff] %vm214_vm1, %v410_v47  ;;  %v408_v48 = vpop.permute.xlu0 %407 }
 0x1cc   :  { %646 = vst.msk [vmem:[%s1340_s10 + $0x40] sm:$0xff] %vm214_vm1, %v408_v48 }
 0x1ce   :  { %v419_v49 = vpop.permute.xlu1 %418 }
 0x1cf   :  { %649 = vst.msk [vmem:[%s1340_s10 + $0x58] sm:$0xff] %vm214_vm1, %v419_v49  ;;  %v417_v50 = vpop.permute.xlu0 %416 }
 0x1d0   :  { %648 = vst.msk [vmem:[%s1340_s10 + $0x50] sm:$0xff] %vm214_vm1, %v417_v50 }
 0x1d2   :  { %v428_v51 = vpop.permute.xlu1 %427 }
 0x1d3   :  { %651 = vst.msk [vmem:[%s1340_s10 + $0x68] sm:$0xff] %vm214_vm1, %v428_v51  ;;  %v426_v52 = vpop.permute.xlu0 %425 }
 0x1d4   :  { %650 = vst.msk [vmem:[%s1340_s10 + $0x60] sm:$0xff] %vm214_vm1, %v426_v52 }
 0x1d6   :  { %v437_v53 = vpop.permute.xlu1 %436 }
 0x1d7   :  { %653 = vst.msk [vmem:[%s1340_s10 + $0x78] sm:$0xff] %vm214_vm1, %v437_v53  ;;  %v435_v54 = vpop.permute.xlu0 %434 }
 0x1d8   :  { %652 = vst.msk [vmem:[%s1340_s10 + $0x70] sm:$0xff] %vm214_vm1, %v435_v54 }
 0x1da   :  { %v231_v55 = vpop.permute.xlu1 %230 }
 0x1db   :  { %626 = vst.msk [vmem:[%s1339_s9 + $0x28] sm:$0xff] %vm214_vm1, %v231_v55  ;;  %v222_v56 = vpop.permute.xlu0 %221 }
 0x1dc   :  { %624 = vst.msk [vmem:[%s1339_s9 + $0x18] sm:$0xff] %vm214_vm1, %v222_v56 }
 0x1de   :  { %v240_v57 = vpop.permute.xlu1 %239 }
 0x1df   :  { %628 = vst.msk [vmem:[%s1339_s9 + $0x38] sm:$0xff] %vm214_vm1, %v240_v57  ;;  %v220_v58 = vpop.permute.xlu0 %219 }
 0x1e0   :  { %623 = vst.msk [vmem:[%s1339_s9 + $0x10] sm:$0xff] %vm214_vm1, %v220_v58 }
 0x1e2   :  { %v249_v59 = vpop.permute.xlu1 %248 }
 0x1e3   :  { %630 = vst.msk [vmem:[%s1339_s9 + $0x48] sm:$0xff] %vm214_vm1, %v249_v59  ;;  %v238_v60 = vpop.permute.xlu0 %237 }
 0x1e4   :  { %627 = vst.msk [vmem:[%s1339_s9 + $0x30] sm:$0xff] %vm214_vm1, %v238_v60 }
 0x1e6   :  { %v258_v61 = vpop.permute.xlu1 %257 }
 0x1e7   :  { %632 = vst.msk [vmem:[%s1339_s9 + $0x58] sm:$0xff] %vm214_vm1, %v258_v61  ;;  %v247_v62 = vpop.permute.xlu0 %246 }
 0x1e8   :  { %629 = vst.msk [vmem:[%s1339_s9 + $0x40] sm:$0xff] %vm214_vm1, %v247_v62 }
 0x1ea   :  { %v267_v63 = vpop.permute.xlu1 %266 }
 0x1eb   :  { %634 = vst.msk [vmem:[%s1339_s9 + $0x68] sm:$0xff] %vm214_vm1, %v267_v63  ;;  %v256_v0 = vpop.permute.xlu0 %255 }
 0x1ec   :  { %631 = vst.msk [vmem:[%s1339_s9 + $0x50] sm:$0xff] %vm214_vm1, %v256_v0 }
 0x1ee   :  { %v276_v1 = vpop.permute.xlu1 %275 }
 0x1ef   :  { %636 = vst.msk [vmem:[%s1339_s9 + $0x78] sm:$0xff] %vm214_vm1, %v276_v1  ;;  %v265_v2 = vpop.permute.xlu0 %264 }
 0x1f0   :  { %633 = vst.msk [vmem:[%s1339_s9 + $0x60] sm:$0xff] %vm214_vm1, %v265_v2 }
 0x1f2   :  { %v229_v3 = vpop.permute.xlu1 %228 }
 0x1f3   :  { %625 = vst.msk [vmem:[%s1339_s9 + $0x20] sm:$0xff] %vm214_vm1, %v229_v3  ;;  %v274_v4 = vpop.permute.xlu0 %273 }
 0x1f4   :  { %635 = vst.msk [vmem:[%s1339_s9 + $0x70] sm:$0xff] %vm214_vm1, %v274_v4 }
 0x1f6   :  { %v544_v5 = vpop.permute.xlu1 %543 }
 0x1f7   :  { %658 = vst.msk [vmem:[%s1341_s11 + $0x18] sm:$0xff] %vm214_vm1, %v544_v5  ;;  %v542_v6 = vpop.permute.xlu0 %541 }
 0x1f8   :  { %657 = vst.msk [vmem:[%s1341_s11 + $0x10] sm:$0xff] %vm214_vm1, %v542_v6 }
 0x1fa   :  { %v553_v7 = vpop.permute.xlu1 %552 }
 0x1fb   :  { %660 = vst.msk [vmem:[%s1341_s11 + $0x28] sm:$0xff] %vm214_vm1, %v553_v7  ;;  %v551_v8 = vpop.permute.xlu0 %550 }
 0x1fc   :  { %659 = vst.msk [vmem:[%s1341_s11 + $0x20] sm:$0xff] %vm214_vm1, %v551_v8 }
 0x1fe   :  { %v562_v9 = vpop.permute.xlu1 %561 }
 0x1ff   :  { %662 = vst.msk [vmem:[%s1341_s11 + $0x38] sm:$0xff] %vm214_vm1, %v562_v9  ;;  %v560_v10 = vpop.permute.xlu0 %559 }
 0x200   :  { %661 = vst.msk [vmem:[%s1341_s11 + $0x30] sm:$0xff] %vm214_vm1, %v560_v10 }
 0x202   :  { %v571_v11 = vpop.permute.xlu1 %570 }
 0x203   :  { %664 = vst.msk [vmem:[%s1341_s11 + $0x48] sm:$0xff] %vm214_vm1, %v571_v11  ;;  %v569_v12 = vpop.permute.xlu0 %568 }
 0x204   :  { %663 = vst.msk [vmem:[%s1341_s11 + $0x40] sm:$0xff] %vm214_vm1, %v569_v12 }
 0x206   :  { %v580_v13 = vpop.permute.xlu1 %579 }
 0x207   :  { %666 = vst.msk [vmem:[%s1341_s11 + $0x58] sm:$0xff] %vm214_vm1, %v580_v13  ;;  %v578_v14 = vpop.permute.xlu0 %577 }
 0x208   :  { %665 = vst.msk [vmem:[%s1341_s11 + $0x50] sm:$0xff] %vm214_vm1, %v578_v14 }
 0x20a   :  { %v589_v15 = vpop.permute.xlu1 %588 }
 0x20b   :  { %668 = vst.msk [vmem:[%s1341_s11 + $0x68] sm:$0xff] %vm214_vm1, %v589_v15  ;;  %v587_v16 = vpop.permute.xlu0 %586 }
 0x20c   :  { %667 = vst.msk [vmem:[%s1341_s11 + $0x60] sm:$0xff] %vm214_vm1, %v587_v16 }
 0x20e   :  { %v598_v17 = vpop.permute.xlu1 %597 }
 0x20f   :  { %670 = vst.msk [vmem:[%s1341_s11 + $0x78] sm:$0xff] %vm214_vm1, %v598_v17  ;;  %v596_v18 = vpop.permute.xlu0 %595 }
 0x210   :  { %669 = vst.msk [vmem:[%s1341_s11 + $0x70] sm:$0xff] %vm214_vm1, %v596_v18 }
 0x211   :  { %616 = vsyncpa [#allocation3], 1 }
 0x212   :  { %617 = vsyncpa [#allocation5], 1 }
 0x213   :  { %618 = vsyncpa [#allocation8], 1 }
 0x214   :  { %619 = vsyncpa [#allocation11], 1 }

</bundles_post_ra>
